<compile_context>
chip_gen: v7x
topology: tpu7x:2x2x1
jax: 0.10.0
libtpu: 0.0.40
codegen_flags: <defaults>
</compile_context>

<pallas_src>
import functools

import jax
import jax.numpy as jnp
import numpy as np
from jax import lax
from jax.experimental import pallas as pl
from jax.experimental.pallas import tpu as pltpu


# ----------------------------------- kernel -----------------------------------------
def _attention_kernel(x_ref, wqkv_ref, wout_ref, bout_ref, o_ref, *,
                      tb, n, heads, dim_head, scale):
    """Fused attention for TB batch elements (TB*n rows).

    x_ref    : (tb*n, dim)      bf16
    wqkv_ref : (dim, 3*inner)   bf16   (to_qkv, no bias)
    wout_ref : (inner, dim)     bf16   (to_out[0] weight)
    bout_ref : (1, dim)         f32    (to_out[0] bias)
    o_ref    : (tb*n, dim)      f32
    """
    inner = heads * dim_head
    dim = o_ref.shape[-1]

    # 1) QKV projection for the whole row slab in ONE MXU call (f32 accumulate),
    #    then a single bf16 cast of the slab for downstream matmul operands.
    qkv_f32 = jnp.dot(x_ref[...], wqkv_ref[...],
                      preferred_element_type=jnp.float32)          # (tb*n, 3*inner)
    qkv = qkv_f32.astype(jnp.bfloat16)

    # Fold the softmax scale into q when that touches fewer elements than
    # scaling the (n, n) score matrix.
    scale_q = n > dim_head

    # Bias broadcast hoisted out of the loops (broadcast_in_dim is not CSE'd).
    bias = jnp.broadcast_to(bout_ref[...], (n, dim))                # (n, dim) f32

    for i in range(tb):                                             # unrolled, tb small
        r0 = i * n
        y_i = bias                                                  # f32 accumulator
        for h in range(heads):                                      # unrolled
            lo = h * dim_head
            if scale_q:
                q = (qkv_f32[r0:r0 + n, lo:lo + dim_head] * scale
                     ).astype(jnp.bfloat16)                         # (n, dh)
            else:
                q = qkv[r0:r0 + n, lo:lo + dim_head]
            k = qkv[r0:r0 + n, inner + lo:inner + lo + dim_head]
            v = qkv[r0:r0 + n, 2 * inner + lo:2 * inner + lo + dim_head]

            # scores = q k^T (MXU, bf16 operands, f32 accumulation).
            dots = lax.dot_general(q, k, (((1,), (1,)), ((), ())),
                                   preferred_element_type=jnp.float32)   # (n, n)
            if not scale_q:
                dots = dots * scale
            dots = dots - jnp.max(dots, axis=-1, keepdims=True)
            p = jnp.exp(dots)                                       # f32 softmax numer
            denom = jnp.sum(p, axis=-1, keepdims=True)              # (n, 1) f32

            # PV first, then rescale the small (n, dh) result (EUP reciprocal).
            pv = jnp.dot(p.astype(jnp.bfloat16), v,
                         preferred_element_type=jnp.float32)        # (n, dh)
            ctx = pv * pl.reciprocal(denom)                         # exact 1/denom

            # Per-head accumulation into the output projection: no lane concat,
            # no (n, inner) intermediate.
            y_i = y_i + jnp.dot(ctx.astype(jnp.bfloat16),
                                wout_ref[lo:lo + dim_head, :],
                                preferred_element_type=jnp.float32)  # (n, dim)

        o_ref[pl.ds(r0, n), :] = y_i.astype(o_ref.dtype)


# ----------------------------------- wrapper -----------------------------------------
def _pick_tb(b, n, target_rows=256):
    """Batch elements per grid step: ~target_rows rows, but keep >=2 grid steps
    when b >= 2 (v7x has 2 TensorCores), and make TB a divisor of b."""
    cap = max(1, target_rows // max(n, 1))
    if b >= 2:
        cap = min(cap, b // 2)
    cap = max(cap, 1)
    tb = 1
    for d in range(1, cap + 1):
        if b % d == 0:
            tb = d
    return tb


def attention_forward(x, w_qkv, w_out, b_out, *, heads, dim_head):
    """softmax((x Wq)(x Wk)^T * scale) (x Wv) Wo + bo, per head.  mask=None path."""
    b, n, dim = x.shape
    inner = heads * dim_head
    assert w_qkv.shape == (dim, 3 * inner)
    assert w_out.shape == (inner, dim)
    scale = dim_head ** (-0.5)

    tb = _pick_tb(b, n)
    num_blocks = b // tb

    # bf16 operands for the MXU / half the HBM->VMEM DMA bytes; bias stays f32.
    xb = x.reshape(b * n, dim).astype(jnp.bfloat16)     # flatten batch into rows
    wq = w_qkv.astype(jnp.bfloat16)
    wo = w_out.astype(jnp.bfloat16)
    bo = b_out.reshape(1, dim).astype(jnp.float32)

    kernel = functools.partial(_attention_kernel, tb=tb, n=n, heads=heads,
                               dim_head=dim_head, scale=scale)

    out_flat = pl.pallas_call(
        kernel,
        out_shape=jax.ShapeDtypeStruct((b * n, dim), jnp.float32),
        grid_spec=pltpu.PrefetchScalarGridSpec(
            num_scalar_prefetch=0,
            grid=(num_blocks,),
            in_specs=[
                pl.BlockSpec((tb * n, dim), lambda i: (i, 0)),        # x row slab
                pl.BlockSpec((dim, 3 * inner), lambda i: (0, 0)),     # weights: resident
                pl.BlockSpec((inner, dim), lambda i: (0, 0)),
                pl.BlockSpec((1, dim), lambda i: (0, 0)),
            ],
            out_specs=pl.BlockSpec((tb * n, dim), lambda i: (i, 0)),
        ),
        compiler_params=pltpu.CompilerParams(
            dimension_semantics=("parallel",)),                        # megacore-friendly
    )(xb, wq, wo, bo)

    return out_flat.reshape(b, n, dim)


# ------------------------------ pure-JAX reference -----------------------------------
def attention_ref(x, w_qkv, w_out, b_out, *, heads, dim_head):
    b, n, dim = x.shape
    scale = dim_head ** (-0.5)
    qkv = x @ w_qkv
    q, k, v = jnp.split(qkv, 3, axis=-1)

    def split_heads(t):
        return t.reshape(b, n, heads, dim_head).transpose(0, 2, 1, 3)

    q, k, v = map(split_heads, (q, k, v))
    dots = jnp.einsum("bhid,bhjd->bhij", q, k) * scale
    attn = jax.nn.softmax(dots, axis=-1)
    out = jnp.einsum("bhij,bhjd->bhid", attn, v)
    out = out.transpose(0, 2, 1, 3).reshape(b, n, heads * dim_head)
    return out @ w_out + b_out


# -------------------------------------- main -----------------------------------------
if __name__ == "__main__":
    # Shapes consistent with the HyFormer ViT config (dim=64, heads=4, dim_head=16).
    batch, seq, dim, heads, dim_head = 2, 8, 64, 4, 16
    inner = heads * dim_head

    key = jax.random.PRNGKey(0)
    k1, k2, k3, k4 = jax.random.split(key, 4)
    x = jax.random.normal(k1, (batch, seq, dim), jnp.float32)
    w_qkv = 0.05 * jax.random.normal(k2, (dim, 3 * inner), jnp.float32)
    w_out = 0.05 * jax.random.normal(k3, (inner, dim), jnp.float32)
    b_out = 0.05 * jax.random.normal(k4, (dim,), jnp.float32)

    fwd = jax.jit(functools.partial(attention_forward, heads=heads, dim_head=dim_head))
    y = fwd(x, w_qkv, w_out, b_out)
    jax.block_until_ready(y)
    assert y.shape == (batch, seq, dim)

    y_ref = attention_ref(x, w_qkv, w_out, b_out, heads=heads, dim_head=dim_head)
    # bf16 matmul operands -> loose tolerance vs f32 reference.
    np.testing.assert_allclose(np.asarray(y), np.asarray(y_ref), rtol=5e-2, atol=2e-2)

    print("KERNEL_OK")
</pallas_src>

<mosaic_0001>
module attributes {stable_mosaic.version = 11 : i64} {
  func.func @_attention_kernel(%arg0: i32, %arg1: memref<8x64xbf16, #tpu.memory_space<vmem>>, %arg2: memref<64x192xbf16, #tpu.memory_space<vmem>>, %arg3: memref<64x64xbf16, #tpu.memory_space<vmem>>, %arg4: memref<1x64xf32, #tpu.memory_space<vmem>>, %arg5: memref<8x64xf32, #tpu.memory_space<vmem>>) attributes {dimension_semantics = [#tpu.dimension_semantics<parallel>], iteration_bounds = array<i64: 2>, scalar_prefetch = 0 : i64, scratch_operands = 0 : i64, tpu.core_type = #tpu.core_type<tc>, window_params = [{transform_indices = @transform_0, window_bounds = array<i64: 8, 64>}, {pipeline_mode = #tpu.pipeline_mode<synchronous>, transform_indices = @transform_1, window_bounds = array<i64: 64, 192>}, {pipeline_mode = #tpu.pipeline_mode<synchronous>, transform_indices = @transform_2, window_bounds = array<i64: 64, 64>}, {pipeline_mode = #tpu.pipeline_mode<synchronous>, transform_indices = @transform_3, window_bounds = array<i64: 1, 64>}, {transform_indices = @transform_4, window_bounds = array<i64: 8, 64>}]} {
    %c0 = arith.constant 0 : index
    %c0_0 = arith.constant 0 : index
    %0 = vector.load %arg1[%c0, %c0_0] : memref<8x64xbf16, #tpu.memory_space<vmem>>, vector<8x64xbf16>
    %c0_1 = arith.constant 0 : index
    %c0_2 = arith.constant 0 : index
    %1 = vector.load %arg2[%c0_1, %c0_2] : memref<64x192xbf16, #tpu.memory_space<vmem>>, vector<64x192xbf16>
    %cst = arith.constant dense<0.000000e+00> : vector<8x192xf32>
    %2 = tpu.matmul %0, %1, %cst {dimension_numbers = #tpu.dot_dimension_numbers<[1], [0], [0], [1], [0, 0, 1, 1], [], []>} : vector<8x64xbf16>, vector<64x192xbf16>, vector<8x192xf32> -> vector<8x192xf32>
    %3 = arith.truncf %2 : vector<8x192xf32> to vector<8x192xbf16>
    %c0_3 = arith.constant 0 : index
    %c0_4 = arith.constant 0 : index
    %4 = vector.load %arg4[%c0_3, %c0_4] : memref<1x64xf32, #tpu.memory_space<vmem>>, vector<1x64xf32>
    %5 = vector.shape_cast %4 : vector<1x64xf32> to vector<1x64xf32>
    %6 = vector.broadcast %5 : vector<1x64xf32> to vector<8x64xf32>
    %7 = vector.extract_strided_slice %3 {offsets = [0, 0], sizes = [8, 16], strides = [1, 1]} : vector<8x192xbf16> to vector<8x16xbf16>
    %8 = vector.extract_strided_slice %3 {offsets = [0, 64], sizes = [8, 16], strides = [1, 1]} : vector<8x192xbf16> to vector<8x16xbf16>
    %9 = vector.extract_strided_slice %3 {offsets = [0, 128], sizes = [8, 16], strides = [1, 1]} : vector<8x192xbf16> to vector<8x16xbf16>
    %cst_5 = arith.constant dense<0.000000e+00> : vector<8x8xf32>
    %10 = tpu.matmul %7, %8, %cst_5 {dimension_numbers = #tpu.dot_dimension_numbers<[1], [1], [0], [0], [0, 0, 1, 0], [], []>} : vector<8x16xbf16>, vector<8x16xbf16>, vector<8x8xf32> -> vector<8x8xf32>
    %cst_6 = arith.constant 2.500000e-01 : f32
    %11 = vector.broadcast %cst_6 : f32 to vector<8x8xf32>
    %12 = arith.mulf %10, %11 : vector<8x8xf32>
    %cst_7 = arith.constant dense<0xFF800000> : vector<8xf32>
    %13 = vector.multi_reduction <maximumf>, %12, %cst_7 [1] : vector<8x8xf32> to vector<8xf32>
    %14 = vector.shape_cast %13 : vector<8xf32> to vector<8x1xf32>
    %15 = vector.broadcast %14 : vector<8x1xf32> to vector<8x8xf32>
    %16 = arith.subf %12, %15 : vector<8x8xf32>
    %17 = math.exp %16 : vector<8x8xf32>
    %cst_8 = arith.constant dense<0.000000e+00> : vector<8xf32>
    %18 = vector.multi_reduction <add>, %17, %cst_8 [1] : vector<8x8xf32> to vector<8xf32>
    %19 = vector.shape_cast %18 : vector<8xf32> to vector<8x1xf32>
    %20 = arith.truncf %17 : vector<8x8xf32> to vector<8x8xbf16>
    %cst_9 = arith.constant dense<0.000000e+00> : vector<8x16xf32>
    %21 = tpu.matmul %20, %9, %cst_9 {dimension_numbers = #tpu.dot_dimension_numbers<[1], [0], [0], [1], [0, 0, 1, 1], [], []>} : vector<8x8xbf16>, vector<8x16xbf16>, vector<8x16xf32> -> vector<8x16xf32>
    %22 = tpu.reciprocal %19 : vector<8x1xf32> -> vector<8x1xf32>
    %23 = vector.broadcast %22 : vector<8x1xf32> to vector<8x16xf32>
    %24 = arith.mulf %21, %23 : vector<8x16xf32>
    %25 = arith.truncf %24 : vector<8x16xf32> to vector<8x16xbf16>
    %c0_10 = arith.constant 0 : index
    %c0_11 = arith.constant 0 : index
    %26 = vector.load %arg3[%c0_10, %c0_11] : memref<64x64xbf16, #tpu.memory_space<vmem>>, vector<16x64xbf16>
    %cst_12 = arith.constant dense<0.000000e+00> : vector<8x64xf32>
    %27 = tpu.matmul %25, %26, %cst_12 {dimension_numbers = #tpu.dot_dimension_numbers<[1], [0], [0], [1], [0, 0, 1, 1], [], []>} : vector<8x16xbf16>, vector<16x64xbf16>, vector<8x64xf32> -> vector<8x64xf32>
    %28 = arith.addf %6, %27 : vector<8x64xf32>
    %29 = vector.extract_strided_slice %3 {offsets = [0, 16], sizes = [8, 16], strides = [1, 1]} : vector<8x192xbf16> to vector<8x16xbf16>
    %30 = vector.extract_strided_slice %3 {offsets = [0, 80], sizes = [8, 16], strides = [1, 1]} : vector<8x192xbf16> to vector<8x16xbf16>
    %31 = vector.extract_strided_slice %3 {offsets = [0, 144], sizes = [8, 16], strides = [1, 1]} : vector<8x192xbf16> to vector<8x16xbf16>
    %cst_13 = arith.constant dense<0.000000e+00> : vector<8x8xf32>
    %32 = tpu.matmul %29, %30, %cst_13 {dimension_numbers = #tpu.dot_dimension_numbers<[1], [1], [0], [0], [0, 0, 1, 0], [], []>} : vector<8x16xbf16>, vector<8x16xbf16>, vector<8x8xf32> -> vector<8x8xf32>
    %cst_14 = arith.constant 2.500000e-01 : f32
    %33 = vector.broadcast %cst_14 : f32 to vector<8x8xf32>
    %34 = arith.mulf %32, %33 : vector<8x8xf32>
    %cst_15 = arith.constant dense<0xFF800000> : vector<8xf32>
    %35 = vector.multi_reduction <maximumf>, %34, %cst_15 [1] : vector<8x8xf32> to vector<8xf32>
    %36 = vector.shape_cast %35 : vector<8xf32> to vector<8x1xf32>
    %37 = vector.broadcast %36 : vector<8x1xf32> to vector<8x8xf32>
    %38 = arith.subf %34, %37 : vector<8x8xf32>
    %39 = math.exp %38 : vector<8x8xf32>
    %cst_16 = arith.constant dense<0.000000e+00> : vector<8xf32>
    %40 = vector.multi_reduction <add>, %39, %cst_16 [1] : vector<8x8xf32> to vector<8xf32>
    %41 = vector.shape_cast %40 : vector<8xf32> to vector<8x1xf32>
    %42 = arith.truncf %39 : vector<8x8xf32> to vector<8x8xbf16>
    %cst_17 = arith.constant dense<0.000000e+00> : vector<8x16xf32>
    %43 = tpu.matmul %42, %31, %cst_17 {dimension_numbers = #tpu.dot_dimension_numbers<[1], [0], [0], [1], [0, 0, 1, 1], [], []>} : vector<8x8xbf16>, vector<8x16xbf16>, vector<8x16xf32> -> vector<8x16xf32>
    %44 = tpu.reciprocal %41 : vector<8x1xf32> -> vector<8x1xf32>
    %45 = vector.broadcast %44 : vector<8x1xf32> to vector<8x16xf32>
    %46 = arith.mulf %43, %45 : vector<8x16xf32>
    %47 = arith.truncf %46 : vector<8x16xf32> to vector<8x16xbf16>
    %c16 = arith.constant 16 : index
    %c0_18 = arith.constant 0 : index
    %48 = vector.load %arg3[%c16, %c0_18] : memref<64x64xbf16, #tpu.memory_space<vmem>>, vector<16x64xbf16>
    %cst_19 = arith.constant dense<0.000000e+00> : vector<8x64xf32>
    %49 = tpu.matmul %47, %48, %cst_19 {dimension_numbers = #tpu.dot_dimension_numbers<[1], [0], [0], [1], [0, 0, 1, 1], [], []>} : vector<8x16xbf16>, vector<16x64xbf16>, vector<8x64xf32> -> vector<8x64xf32>
    %50 = arith.addf %28, %49 : vector<8x64xf32>
    %51 = vector.extract_strided_slice %3 {offsets = [0, 32], sizes = [8, 16], strides = [1, 1]} : vector<8x192xbf16> to vector<8x16xbf16>
    %52 = vector.extract_strided_slice %3 {offsets = [0, 96], sizes = [8, 16], strides = [1, 1]} : vector<8x192xbf16> to vector<8x16xbf16>
    %53 = vector.extract_strided_slice %3 {offsets = [0, 160], sizes = [8, 16], strides = [1, 1]} : vector<8x192xbf16> to vector<8x16xbf16>
    %cst_20 = arith.constant dense<0.000000e+00> : vector<8x8xf32>
    %54 = tpu.matmul %51, %52, %cst_20 {dimension_numbers = #tpu.dot_dimension_numbers<[1], [1], [0], [0], [0, 0, 1, 0], [], []>} : vector<8x16xbf16>, vector<8x16xbf16>, vector<8x8xf32> -> vector<8x8xf32>
    %cst_21 = arith.constant 2.500000e-01 : f32
    %55 = vector.broadcast %cst_21 : f32 to vector<8x8xf32>
    %56 = arith.mulf %54, %55 : vector<8x8xf32>
    %cst_22 = arith.constant dense<0xFF800000> : vector<8xf32>
    %57 = vector.multi_reduction <maximumf>, %56, %cst_22 [1] : vector<8x8xf32> to vector<8xf32>
    %58 = vector.shape_cast %57 : vector<8xf32> to vector<8x1xf32>
    %59 = vector.broadcast %58 : vector<8x1xf32> to vector<8x8xf32>
    %60 = arith.subf %56, %59 : vector<8x8xf32>
    %61 = math.exp %60 : vector<8x8xf32>
    %cst_23 = arith.constant dense<0.000000e+00> : vector<8xf32>
    %62 = vector.multi_reduction <add>, %61, %cst_23 [1] : vector<8x8xf32> to vector<8xf32>
    %63 = vector.shape_cast %62 : vector<8xf32> to vector<8x1xf32>
    %64 = arith.truncf %61 : vector<8x8xf32> to vector<8x8xbf16>
    %cst_24 = arith.constant dense<0.000000e+00> : vector<8x16xf32>
    %65 = tpu.matmul %64, %53, %cst_24 {dimension_numbers = #tpu.dot_dimension_numbers<[1], [0], [0], [1], [0, 0, 1, 1], [], []>} : vector<8x8xbf16>, vector<8x16xbf16>, vector<8x16xf32> -> vector<8x16xf32>
    %66 = tpu.reciprocal %63 : vector<8x1xf32> -> vector<8x1xf32>
    %67 = vector.broadcast %66 : vector<8x1xf32> to vector<8x16xf32>
    %68 = arith.mulf %65, %67 : vector<8x16xf32>
    %69 = arith.truncf %68 : vector<8x16xf32> to vector<8x16xbf16>
    %c32 = arith.constant 32 : index
    %c0_25 = arith.constant 0 : index
    %70 = vector.load %arg3[%c32, %c0_25] : memref<64x64xbf16, #tpu.memory_space<vmem>>, vector<16x64xbf16>
    %cst_26 = arith.constant dense<0.000000e+00> : vector<8x64xf32>
    %71 = tpu.matmul %69, %70, %cst_26 {dimension_numbers = #tpu.dot_dimension_numbers<[1], [0], [0], [1], [0, 0, 1, 1], [], []>} : vector<8x16xbf16>, vector<16x64xbf16>, vector<8x64xf32> -> vector<8x64xf32>
    %72 = arith.addf %50, %71 : vector<8x64xf32>
    %73 = vector.extract_strided_slice %3 {offsets = [0, 48], sizes = [8, 16], strides = [1, 1]} : vector<8x192xbf16> to vector<8x16xbf16>
    %74 = vector.extract_strided_slice %3 {offsets = [0, 112], sizes = [8, 16], strides = [1, 1]} : vector<8x192xbf16> to vector<8x16xbf16>
    %75 = vector.extract_strided_slice %3 {offsets = [0, 176], sizes = [8, 16], strides = [1, 1]} : vector<8x192xbf16> to vector<8x16xbf16>
    %cst_27 = arith.constant dense<0.000000e+00> : vector<8x8xf32>
    %76 = tpu.matmul %73, %74, %cst_27 {dimension_numbers = #tpu.dot_dimension_numbers<[1], [1], [0], [0], [0, 0, 1, 0], [], []>} : vector<8x16xbf16>, vector<8x16xbf16>, vector<8x8xf32> -> vector<8x8xf32>
    %cst_28 = arith.constant 2.500000e-01 : f32
    %77 = vector.broadcast %cst_28 : f32 to vector<8x8xf32>
    %78 = arith.mulf %76, %77 : vector<8x8xf32>
    %cst_29 = arith.constant dense<0xFF800000> : vector<8xf32>
    %79 = vector.multi_reduction <maximumf>, %78, %cst_29 [1] : vector<8x8xf32> to vector<8xf32>
    %80 = vector.shape_cast %79 : vector<8xf32> to vector<8x1xf32>
    %81 = vector.broadcast %80 : vector<8x1xf32> to vector<8x8xf32>
    %82 = arith.subf %78, %81 : vector<8x8xf32>
    %83 = math.exp %82 : vector<8x8xf32>
    %cst_30 = arith.constant dense<0.000000e+00> : vector<8xf32>
    %84 = vector.multi_reduction <add>, %83, %cst_30 [1] : vector<8x8xf32> to vector<8xf32>
    %85 = vector.shape_cast %84 : vector<8xf32> to vector<8x1xf32>
    %86 = arith.truncf %83 : vector<8x8xf32> to vector<8x8xbf16>
    %cst_31 = arith.constant dense<0.000000e+00> : vector<8x16xf32>
    %87 = tpu.matmul %86, %75, %cst_31 {dimension_numbers = #tpu.dot_dimension_numbers<[1], [0], [0], [1], [0, 0, 1, 1], [], []>} : vector<8x8xbf16>, vector<8x16xbf16>, vector<8x16xf32> -> vector<8x16xf32>
    %88 = tpu.reciprocal %85 : vector<8x1xf32> -> vector<8x1xf32>
    %89 = vector.broadcast %88 : vector<8x1xf32> to vector<8x16xf32>
    %90 = arith.mulf %87, %89 : vector<8x16xf32>
    %91 = arith.truncf %90 : vector<8x16xf32> to vector<8x16xbf16>
    %c48 = arith.constant 48 : index
    %c0_32 = arith.constant 0 : index
    %92 = vector.load %arg3[%c48, %c0_32] : memref<64x64xbf16, #tpu.memory_space<vmem>>, vector<16x64xbf16>
    %cst_33 = arith.constant dense<0.000000e+00> : vector<8x64xf32>
    %93 = tpu.matmul %91, %92, %cst_33 {dimension_numbers = #tpu.dot_dimension_numbers<[1], [0], [0], [1], [0, 0, 1, 1], [], []>} : vector<8x16xbf16>, vector<16x64xbf16>, vector<8x64xf32> -> vector<8x64xf32>
    %94 = arith.addf %72, %93 : vector<8x64xf32>
    %c0_34 = arith.constant 0 : index
    %c0_35 = arith.constant 0 : index
    %95 = vector.load %arg5[%c0_34, %c0_35] : memref<8x64xf32, #tpu.memory_space<vmem>>, vector<8x64xf32>
    tpu.vector_store %arg5[%c0_34, %c0_35], %94 {strides = array<i32>} : memref<8x64xf32, #tpu.memory_space<vmem>>, vector<8x64xf32>,
    return
  }
  func.func @transform_0(%arg0: i32) -> (i32, i32) {
    %c0_i32 = arith.constant 0 : i32
    %c0_i32_0 = arith.constant 0 : i32
    return %arg0, %c0_i32 : i32, i32
  }
  func.func @transform_1(%arg0: i32) -> (i32, i32) {
    %c0_i32 = arith.constant 0 : i32
    %c0_i32_0 = arith.constant 0 : i32
    %c0_i32_1 = arith.constant 0 : i32
    return %c0_i32, %c0_i32_0 : i32, i32
  }
  func.func @transform_2(%arg0: i32) -> (i32, i32) {
    %c0_i32 = arith.constant 0 : i32
    %c0_i32_0 = arith.constant 0 : i32
    %c0_i32_1 = arith.constant 0 : i32
    return %c0_i32, %c0_i32_0 : i32, i32
  }
  func.func @transform_3(%arg0: i32) -> (i32, i32) {
    %c0_i32 = arith.constant 0 : i32
    %c0_i32_0 = arith.constant 0 : i32
    %c0_i32_1 = arith.constant 0 : i32
    return %c0_i32, %c0_i32_0 : i32, i32
  }
  func.func @transform_4(%arg0: i32) -> (i32, i32) {
    %c0_i32 = arith.constant 0 : i32
    %c0_i32_0 = arith.constant 0 : i32
    return %arg0, %c0_i32 : i32, i32
  }
}

</mosaic_0001>

<bundles_post_ra>
// kernel: attention_forward.1
= control target key start
LH: loop header
LB: loop body
LE: loop exit
PB: predicated region body
PF: predicated region fallthrough
CT: control target
= control target key end

     0   :  { %9 = vsyncpa [#allocation3], 0  ;;  %s1569_s0 = inlined_call_operand.vmem [shape: bf16[16,64], index: 0, kind: input, shape index: {}]   ;;  %s1570_s1 = inlined_call_operand.vmem [shape: bf16[64,192], index: 1, kind: input, shape index: {}]   ;;  %s1571_s2 = inlined_call_operand.vmem [shape: bf16[64,64], index: 2, kind: input, shape index: {}]   ;;  %s1572_s3 = inlined_call_operand.vmem [shape: f32[1,64], index: 3, kind: input, shape index: {}]   ;;  %s1573_s4 = inlined_call_operand.hbm [shape: f32[16,64], index: 4, kind: output, shape index: {}]  }
   0x1   :  { %11 = vsyncpa [#allocation3 + $0x1], 0  ;;  %s1351_s15 = smov 0   ;;  %s1353_s16 = smov 0  }
   0x2   :  { %s1355_s17 = smov 0   ;;  %s1357_s18 = smov 0  }
   0x3 LB: > { %s1372_s19 = sadd.s32 4294967295, %s1313_s18   ;;  %s1028_s20 = sadd.s32 4294967294, %s1313_s18   ;;  %s1313_s18 = sphi %s1357_s18, %s1579_s18   ;;  %s1309_s17 = sphi %s1355_s17, %s1578_s17   ;;  %s1305_s16 = sphi %s1353_s16, %s1577_s16   ;;  %s1301_s15 = sphi %s1351_s15, %s1576_s15  }
   0x4   : > { %s1376_s21 = sadd.s32 1, %s1313_s18   ;;  %s113_s22 = sadd.s32 1, %s1309_s17 }
   0x5   : > { %s110_s23 = ssub.s32 %s1313_s18, %s1376_s21  ;;  %p123_p0 = scmp.ne.s32.totalorder %s1309_s17, %s1305_s16 }
   0x6   : > { %p111_p1 = scmp.eq.s32.totalorder %s110_s23, 0  ;;  %p124_p2 = scmp.eq.s32.totalorder %s1372_s19, 1 }
   0x7   : > { %p129_p3 = scmp.ne.s32.totalorder %s1305_s16, %s1301_s15  ;;  %p130_p4 = scmp.eq.s32.totalorder %s1028_s20, 1 }
   0x8   : > { %s1387_s24 = scalar_select %p111_p1, %s1309_s17, %s113_s22  }
   0x9   : > { %p1389_p5 = por %p124_p2, %p123_p0  ;;  %p1393_p6 = por %p130_p4, %p129_p3 }
   0xa   : > { %p1031_p7 = scmp.ge.s32.totalorder %s1313_s18, 1  ;;  %p164_p8 = scmp.lt.s32.totalorder %s1313_s18, 3 }
   0xc   : > { %p165_p9 = pnand %p1031_p7, %p164_p8 }
   0xd   : > { %v1219_v0 = vld [vmem:[%s1570_s1 + $0x4] ss:$8 sps:$4 sm:$0xff] (!%p165_p9)   ;;  %v1221_v1 = vld [vmem:[%s1570_s1] ss:$8 sps:$4 sm:$0xff] (!%p165_p9)   ;;  %v1315_v2 = vmov (!%p165_p9), 0   ;;  %p189_p10 = scmp.lt.s32.totalorder (!%p165_p9), %s1372_s19, 1 }
   0xe   : > { %168 = sbr.rel (%p165_p9) target bundleno = 2173 (0x87d), region = 36  ;;  %279 = vmatprep.mubr.bf16.mxu0 (!%p165_p9), %v1315_v2  ;;  %247 = vmatprep.subr.bf16.mxu0 (!%p165_p9), %v1219_v0  ;;  %v1222_v3 = vld [vmem:[%s1570_s1 + $0x14] ss:$8 sps:$4 sm:$0xff] (!%p165_p9)   ;;  %v1224_v4 = vld [vmem:[%s1570_s1 + $0x10] ss:$8 sps:$4 sm:$0xff] (!%p165_p9)   ;;  %vm243_vm0 = vcmask (!%p165_p9), 523264  }
   0xf   : > { %248 = vmatpush1.bf16.msra.mxu0 (!%p165_p9), %v1221_v1  ;;  %v1225_v5 = vld [vmem:[%s1570_s1 + $0x24] ss:$8 sps:$4 sm:$0xff] (!%p165_p9)   ;;  %v1227_v6 = vld [vmem:[%s1570_s1 + $0x20] ss:$8 sps:$4 sm:$0xff] (!%p165_p9)   ;;  %v1228_v7 = vld [vmem:[%s1570_s1 + $0x34] ss:$8 sps:$4 sm:$0xff] (!%p165_p9)  }
  0x10   : > { %249 = vmatprep.subr.bf16.mxu0 (!%p165_p9), %v1222_v3  ;;  %v1230_v8 = vld [vmem:[%s1570_s1 + $0x30] ss:$8 sps:$4 sm:$0xff] (!%p165_p9)   ;;  %v1316_v10 = vmov (!%p165_p9), 0.0   ;;  %vm1317_vm1 = vmmov (!%p165_p9), 0   ;;  %s1318_s5 = smov (!%p165_p9), 48   ;;  %s1319_s6 = smov (!%p165_p9), 64  }
  0x11   : > { %1088 = vmatprep.subr.bf16.mxu1 (!%p165_p9), %v1316_v10  ;;  %1090 = vmatprep.mubr.msk.bf16.mxu1 (!%p165_p9), %vm1317_vm1, %v1316_v10  ;;  %vm300_vm2 = vcmask (!%p165_p9), 130048   ;;  %vm362_vm3 = vcmask (!%p165_p9), 1043456   ;;  %vm348_vm4 = vcmask (!%p165_p9), 64512   ;;  %s1320_s7 = smov (!%p165_p9), 96   ;;  %s1321_s8 = smov (!%p165_p9), 16   ;;  %v1231_v32 = vld [vmem:[%s1571_s2] sm:$0xff] (!%p165_p9)  }
  0x12   : > { %s1322_s9 = smov (!%p165_p9), 80   ;;  %s1323_s10 = smov (!%p165_p9), 112  }
  0x13   : > { %250 = vmatpush1.bf16.msra.mxu0 (!%p165_p9), %v1224_v4  ;;  %s186_s29 = sand.u32 (!%p165_p9), 1, %s1305_s16   ;;  %s1325_s14 = smov (!%p165_p9), [#allocation2]  }
  0x14   : > { %251 = vmatprep.subr.bf16.mxu0 (!%p165_p9), %v1225_v5  ;;  %s1255_s20 = sshll.u32 (!%p165_p9), %s1325_s14, 4  ;;  %s1256_s20 = int_to_ptr.vmem [resolvable:$false] %s1255_s20 }
  0x15   : > { %s190_s11 = scalar_select %p189_p10, %s1372_s19, 1 }
  0x17   : > { %s1033_s22 = sshll.u32 %s190_s11, 2  ;;  %252 = vmatpush1.bf16.msra.mxu0 %v1227_v6  ;;  %s1324_s11 = smov 32  }
  0x18   : > { %253 = vmatprep.subr.bf16.mxu0 %v1228_v7  ;;  %s192_s30 = scalar_lea.vmem %s1569_s0, %s1033_s22  ;;  %s1257_s22 = scalar_lea.vmem %s1256_s20, 256 }
  0x19   : > { %v194_v9 = vld [vmem:[%s192_s30] sm:$0xf]  ;;  %s1032_s30 = sshll.u32 %s186_s29, 3 }
  0x1b   : > { %254 = vmatpush1.bf16.msra.mxu0 %v1230_v8 }
  0x1c   : > { %1112 = vmatprep.subr.bf16.mxu0 %v1316_v10 }
  0x1e   : > { %1042 = vmatmul.mubr.msk.bf16.vlgmr.msra.gmra.mrb[0].mxu0 %vm243_vm0, %v194_v9 }
  0x1f   : > { %1114 = vmatprep.mubr.msk.bf16.mxu0 %vm1317_vm1, %v1316_v10 }
  0xf1   : > { %v281_v11 = vpop.f32.mrb[0].mxu0 }
  0xf2   : > { %v288_v12 = vpack.c.bf16 %v281_v11, %v281_v11  ;;  %v283_v13 = vpop.f32.mrb[1].mxu0 }
  0xf3   : > { %v285_v14 = vpop.f32.mrb[2].mxu0  ;;  %v1437_v18 = vpack.c.bf16 %v283_v13, %v283_v13 }
  0xf4   : > { %463 = vrot.lane.b32.xlu1 %v288_v12, %s1318_s5  ;;  %298 = vrot.lane.b32.xlu0 %v288_v12, %s1319_s6  ;;  %v286_v15 = vpop.f32.mrb[3].mxu0 }
  0xf5   : > { %v364_v19 = vsel %vm362_vm3, %v1437_v18, 0 }
 0x166   : > { %v299_v16 = vpop.permute.xlu0 %298  ;;  %v464_v33 = vpop.permute.xlu1 %463 }
 0x167   : > { %v305_v17 = vsel %vm300_vm2, %v299_v16, 0  ;;  %v469_v43 = vsel %vm300_vm2, %v464_v33, 0 }
 0x168   : > { %1089 = vmatpush3.bf16.xpose.msra.mxu1 %v305_v17 }
 0x169   : > { %1094 = vmatprep.subr.bf16.mxu1 %v1316_v10 }
 0x16f   : > { %1091 = vmatmul.mubr.msk.bf16.vlgmr.msra.gmra.mrb[0].mxu1 %vm300_vm2, %v288_v12 }
 0x170   : > { %1095 = vmatpush3.bf16.msra.mxu1 %v364_v19  ;;  %1096 = vmatprep.mubr.msk.bf16.mxu1 %vm1317_vm1, %v1316_v10 }
 0x171   : > { %1100 = vmatprep.subr.bf16.mxu1 %v1316_v10 }
 0x242   : > { %v341_v20 = vpop.f32.mrb[0].mxu1 }
 0x243   : > { %v347_v21 = vmul.f32 0.25, %v341_v20  ;;  %v1092_v22 = vpop.f32.mrb[1].mxu1  ;;  %v1232_v20 = vld [vmem:[%s1571_s2 + $0x8] sm:$0xff]  }
 0x244   : > { %v344_v23 = vpop.f32.mrb[2].mxu1 }
 0x245   : > { %v1093_v24 = vpop.f32.mrb[3].mxu1  ;;  %v349_v25 = vsel %vm348_vm4, %v347_v21, -inf }
 0x246   : > { %350 = vmax.xlane.f32.xlu0 %v349_v25 }
 0x25c   : > { %687 = vrot.lane.b32.xlu0 %v1437_v18, %s1320_s7 }
 0x260   : > { %792 = vrot.lane.b32.xlu0 %v288_v12, %s1321_s8  ;;  %s188_s8 = scalar_lea.vmem [#allocation2], %s1032_s30 }
 0x264   : > { %790 = vrot.lane.b32.xlu0 %v288_v12, %s1322_s9 }
 0x2d3   : > { %v351_v26 = vpop.xlane.xlu0 %350 }
 0x2d4   : > { %v352_v27 = vsub.f32 %v347_v21, %v351_v26 }
 0x2d6   : > { %v353_v28 = vmul.f32 1.442695, %v352_v27 }
 0x2d7   : > { %v688_v46 = vpop.permute.xlu0 %687 }
 0x2d8   : > { %1235 = vpow2.f32 %v353_v28  ;;  %v693_v48 = vsel %vm362_vm3, %v688_v46, 0  ;;  %v1233_v28 = vld [vmem:[%s1571_s2 + $0x10] sm:$0xff]  }
 0x2db   : > { %v793_v1 = vpop.permute.xlu0 %792 }
 0x2dc   : > { %v798_v19 = vsel %vm300_vm2, %v793_v1, 0 }
 0x2df   : > { %v791_v2 = vpop.permute.xlu0 %790 }
 0x2e2   : > { %v1236_v29 = vpop.eup %1235 }
 0x2e3   : > { %v355_v30 = vsel %vm348_vm4, %v1236_v29, 0.0  ;;  %v358_v31 = vpack.c.bf16 %v1236_v29, %v1236_v29 }
 0x2e4   : > { %356 = vadd.xlane.f32.xlu1 %v355_v30 }
 0x2e5   : > { %1097 = vmatmul.mubr.msk.bf16.vlgmr.msra.gmra.mrb[4].mxu1 %vm348_vm4, %v358_v31 }
 0x2e6   : > { %1102 = vmatprep.mubr.msk.bf16.mxu1 %vm1317_vm1, %v1316_v10  ;;  %1101 = vmatpush3.bf16.msra.mxu1 %v1231_v32 }
 0x2e7   : > { %1106 = vmatprep.subr.bf16.mxu1 %v1316_v10 }
 0x2f5   : > { %461 = vrot.lane.b32.xlu1 %v288_v12, %s1323_s10 }
 0x2f9   : > { %628 = vrot.lane.b32.xlu1 %v288_v12, %s1324_s11 }
 0x2fd   : > { %626 = vrot.lane.b32.xlu1 %v288_v12, %s1320_s7  ;;  %s1061_s7 = sshll.u32 %s1372_s19, 7  ;;  %s956_s19 = scalar_lea.sflag [#allocation3], %s186_s29 }
 0x2fe   : > { %s1526_s12 = scalar_lea.hbm %s1573_s4, %s1061_s7 }
 0x371   : > { %v357_v34 = vpop.xlane.xlu1 %356 }
 0x372   : > { %1237 = vrcp.f32 %v357_v34 }
 0x375   : > { %v462_v42 = vpop.permute.xlu1 %461 }
 0x379   : > { %v629_v44 = vpop.permute.xlu1 %628 }
 0x37a   : > { %v634_v45 = vsel %vm300_vm2, %v629_v44, 0 }
 0x37c   : > { %v1238_v35 = vpop.eup %1237 }
 0x37d   : > { %v627_v47 = vpop.permute.xlu1 %626 }
 0x3b8   : > { %v400_v36 = vpop.f32.mrb[4].mxu1 }
 0x3b9   : > { %v407_v37 = vmul.f32 %v1238_v35, %v400_v36  ;;  %v1098_v38 = vpop.f32.mrb[5].mxu1 }
 0x3ba   : > { %v403_v39 = vpop.f32.mrb[6].mxu1 }
 0x3bb   : > { %v408_v40 = vpack.c.bf16 %v407_v37, %v407_v37  ;;  %v1099_v41 = vpop.f32.mrb[7].mxu1 }
 0x3bd   : > { %1103 = vmatmul.mubr.msk.bf16.vlgmr.msra.gmra.mrb[8].mxu1 %vm300_vm2, %v408_v40 }
 0x3be   : > { %1107 = vmatpush3.bf16.xpose.msra.mxu1 %v469_v43  ;;  %1108 = vmatprep.mubr.msk.bf16.mxu1 %vm1317_vm1, %v1316_v10 }
 0x3bf   : > { %1124 = vmatprep.subr.bf16.mxu1 %v1316_v10 }
 0x3c5   : > { %1109 = vmatmul.mubr.msk.bf16.vlgmr.msra.gmra.mrb[12].mxu1 %vm300_vm2, %v462_v42 }
 0x3c6   : > { %1125 = vmatpush3.bf16.xpose.msra.mxu1 %v634_v45  ;;  %1126 = vmatprep.mubr.msk.bf16.mxu1 %vm1317_vm1, %v1316_v10 }
 0x3c7   : > { %1130 = vmatprep.subr.bf16.mxu1 %v1316_v10 }
 0x3cd   : > { %1127 = vmatmul.mubr.msk.bf16.vlgmr.msra.gmra.mrb[16].mxu1 %vm300_vm2, %v627_v47 }
 0x3ce   : > { %1131 = vmatpush3.bf16.msra.mxu1 %v693_v48  ;;  %1132 = vmatprep.mubr.msk.bf16.mxu1 %vm1317_vm1, %v1316_v10 }
 0x3cf   : > { %1142 = vmatprep.subr.bf16.mxu1 %v1316_v10 }
 0x490   : > { %v1472_v49 = vpop.f32.mrb[8].mxu1 }
 0x491   : > { %v1104_v50 = vpop.f32.mrb[9].mxu1 }
 0x492   : > { %v457_v51 = vpop.f32.mrb[10].mxu1 }
 0x493   : > { %v1105_v52 = vpop.f32.mrb[11].mxu1 }
 0x498   : > { %v505_v53 = vpop.f32.mrb[12].mxu1 }
 0x499   : > { %v511_v54 = vmul.f32 0.25, %v505_v53  ;;  %v1110_v55 = vpop.f32.mrb[13].mxu1 }
 0x49a   : > { %v508_v56 = vpop.f32.mrb[14].mxu1 }
 0x49b   : > { %v1111_v57 = vpop.f32.mrb[15].mxu1  ;;  %v512_v58 = vsel %vm348_vm4, %v511_v54, -inf }
 0x49c   : > { %513 = vmax.xlane.f32.xlu0 %v512_v58 }
 0x4a0   : > { %v670_v59 = vpop.f32.mrb[16].mxu1 }
 0x4a1   : > { %v676_v60 = vmul.f32 0.25, %v670_v59  ;;  %v1128_v61 = vpop.f32.mrb[17].mxu1 }
 0x4a2   : > { %v673_v62 = vpop.f32.mrb[18].mxu1 }
 0x4a3   : > { %v1129_v63 = vpop.f32.mrb[19].mxu1  ;;  %v677_v0 = vsel %vm348_vm4, %v676_v60, -inf }
 0x4a4   : > { %678 = vmax.xlane.f32.xlu1 %v677_v0 }
 0x4b5   : > { %523 = vrot.lane.b32.xlu1 %v1437_v18, %s1323_s10 }
 0x529   : > { %v514_v3 = vpop.xlane.xlu0 %513 }
 0x52a   : > { %v515_v4 = vsub.f32 %v511_v54, %v514_v3 }
 0x52c   : > { %v516_v5 = vmul.f32 1.442695, %v515_v4 }
 0x52e   : > { %1239 = vpow2.f32 %v516_v5 }
 0x531   : > { %v679_v6 = vpop.xlane.xlu1 %678 }
 0x532   : > { %v680_v7 = vsub.f32 %v676_v60, %v679_v6 }
 0x534   : > { %v681_v8 = vmul.f32 1.442695, %v680_v7 }
 0x535   : > { %v524_v9 = vpop.permute.xlu1 %523 }
 0x536   : > { %1241 = vpow2.f32 %v681_v8  ;;  %v529_v11 = vsel %vm362_vm3, %v524_v9, 0 }
 0x537   : > { %1113 = vmatpush3.bf16.msra.mxu0 %v529_v11 }
 0x538   : > { %v1240_v12 = vpop.eup %1239  ;;  %1118 = vmatprep.subr.bf16.mxu0 %v1316_v10 }
 0x539   : > { %v518_v13 = vsel %vm348_vm4, %v1240_v12, 0.0  ;;  %v521_v14 = vpack.c.bf16 %v1240_v12, %v1240_v12 }
 0x53a   : > { %519 = vadd.xlane.f32.xlu1 %v518_v13 }
 0x53b   : > { %1115 = vmatmul.mubr.msk.bf16.vlgmr.msra.gmra.mrb[4].mxu0 %vm348_vm4, %v521_v14 }
 0x53c   : > { %1120 = vmatprep.mubr.msk.bf16.mxu0 %vm1317_vm1, %v1316_v10  ;;  %1119 = vmatpush3.bf16.msra.mxu0 %v1232_v20 }
 0x53d   : > { %1136 = vmatprep.subr.bf16.mxu0 %v1316_v10 }
 0x540   : > { %v1242_v15 = vpop.eup %1241 }
 0x541   : > { %v683_v16 = vsel %vm348_vm4, %v1242_v15, 0.0  ;;  %v686_v17 = vpack.c.bf16 %v1242_v15, %v1242_v15 }
 0x542   : > { %684 = vadd.xlane.f32.xlu0 %v683_v16 }
 0x543   : > { %1133 = vmatmul.mubr.msk.bf16.vlgmr.msra.gmra.mrb[20].mxu1 %vm348_vm4, %v686_v17 }
 0x544   : > { %1143 = vmatpush3.bf16.xpose.msra.mxu1 %v798_v19  ;;  %1144 = vmatprep.mubr.msk.bf16.mxu1 %vm1317_vm1, %v1316_v10 }
 0x54b   : > { %1145 = vmatmul.mubr.msk.bf16.vlgmr.msra.gmra.mrb[24].mxu1 %vm300_vm2, %v791_v2 }
 0x5c7   : > { %v520_v21 = vpop.xlane.xlu1 %519 }
 0x5c8   : > { %1243 = vrcp.f32 %v520_v21 }
 0x5cf   : > { %v685_v22 = vpop.xlane.xlu0 %684 }
 0x5d0   : > { %1245 = vrcp.f32 %v685_v22 }
 0x5d2   : > { %v1244_v23 = vpop.eup %1243 }
 0x5da   : > { %v1246_v33 = vpop.eup %1245 }
 0x60e   : > { %v565_v24 = vpop.f32.mrb[4].mxu0 }
 0x60f   : > { %v572_v25 = vmul.f32 %v1244_v23, %v565_v24  ;;  %v1116_v26 = vpop.f32.mrb[5].mxu0 }
 0x610   : > { %v568_v27 = vpop.f32.mrb[6].mxu0 }
 0x611   : > { %v573_v29 = vpack.c.bf16 %v572_v25, %v572_v25  ;;  %v1117_v30 = vpop.f32.mrb[7].mxu0 }
 0x613   : > { %1121 = vmatmul.mubr.msk.bf16.vlgmr.msra.gmra.mrb[8].mxu0 %vm300_vm2, %v573_v29 }
 0x614   : > { %1137 = vmatpush3.bf16.msra.mxu0 %v1233_v28  ;;  %1138 = vmatprep.mubr.msk.bf16.mxu0 %vm1317_vm1, %v1316_v10 }
 0x615   : > { %1148 = vmatprep.subr.bf16.mxu0 %v1316_v10 }
 0x616   : > { %v729_v31 = vpop.f32.mrb[20].mxu1 }
 0x617   : > { %v1134_v32 = vpop.f32.mrb[21].mxu1  ;;  %v736_v35 = vmul.f32 %v1246_v33, %v729_v31 }
 0x618   : > { %v732_v34 = vpop.f32.mrb[22].mxu1 }
 0x619   : > { %v1135_v36 = vpop.f32.mrb[23].mxu1  ;;  %v737_v37 = vpack.c.bf16 %v736_v35, %v736_v35 }
 0x61e   : > { %v834_v38 = vpop.f32.mrb[24].mxu1 }
 0x61f   : > { %v840_v39 = vmul.f32 0.25, %v834_v38  ;;  %1139 = vmatmul.mubr.msk.bf16.vlgmr.msra.gmra.mrb[8].mxu0 %vm300_vm2, %v737_v37  ;;  %v1146_v40 = vpop.f32.mrb[25].mxu1 }
 0x620   : > { %v837_v41 = vpop.f32.mrb[26].mxu1  ;;  %1150 = vmatprep.mubr.msk.bf16.mxu0 %vm1317_vm1, %v1316_v10 }
 0x621   : > { %v1147_v42 = vpop.f32.mrb[27].mxu1  ;;  %v841_v43 = vsel %vm348_vm4, %v840_v39, -inf }
 0x622   : > { %842 = vmax.xlane.f32.xlu0 %v841_v43 }
 0x638   : > { %851 = vrot.lane.b32.xlu0 %v1437_v18, %s1322_s9  ;;  %v1234_v18 = vld [vmem:[%s1571_s2 + $0x18] sm:$0xff]   ;;  %s969_s9 = sshll.u32 %s188_s8, 4  ;;  %s1528_s9 = int_to_ptr.vmem [resolvable:$true] %s969_s9 }
 0x639   : > { %s1251_s13 = scalar_lea.vmem %s1528_s9, 128  ;;  %p1258_p0 = scmp.lt.s32.totalorder %s1528_s9, %s1256_s20 }
 0x63a   : > { %p1252_p11 = scmp.ne.s32.totalorder %s1528_s9, %s1251_s13  ;;  %p1259_p1 = scmp.lt.s32.totalorder %s1257_s22, %s1251_s13 }
 0x63c   : > { %p1253_p12 = pnand %p1252_p11, %p1389_p5  ;;  %p1260_p2 = por %p1259_p1, %p1258_p0 }
 0x63e   : > { %p1254_p13 = pneg %p1253_p12 }
 0x640   : > { %p1261_p3 = pnand %p1260_p2, %p1254_p13 }
 0x6af   : > { %v843_v44 = vpop.xlane.xlu0 %842 }
 0x6b0   : > { %v844_v45 = vsub.f32 %v840_v39, %v843_v44 }
 0x6b2   : > { %v845_v46 = vmul.f32 1.442695, %v844_v45 }
 0x6b3   : > { %v852_v47 = vpop.permute.xlu0 %851 }
 0x6b4   : > { %1247 = vpow2.f32 %v845_v46  ;;  %v857_v48 = vsel %vm362_vm3, %v852_v47, 0 }
 0x6b5   : > { %1149 = vmatpush3.bf16.msra.mxu0 %v857_v48 }
 0x6b6   : > { %1154 = vmatprep.subr.bf16.mxu0 %v1316_v10 }
 0x6be   : > { %v1248_v50 = vpop.eup %1247 }
 0x6bf   : > { %v847_v51 = vsel %vm348_vm4, %v1248_v50, 0.0  ;;  %v850_v52 = vpack.c.bf16 %v1248_v50, %v1248_v50 }
 0x6c0   : > { %848 = vadd.xlane.f32.xlu1 %v847_v51 }
 0x6c1   : > { %1151 = vmatmul.mubr.msk.bf16.vlgmr.msra.gmra.mrb[12].mxu0 %vm348_vm4, %v850_v52 }
 0x6c2   : > { %1156 = vmatprep.mubr.msk.bf16.mxu0 %vm1317_vm1, %v1316_v10  ;;  %1155 = vmatpush3.bf16.msra.mxu0 %v1234_v18  ;;  %v1043_v10 = vld [vmem:[%s1572_s3] ss:$0 sm:$0xff] }
 0x6c3   : > { %v460_v61 = vadd.f32 %v1043_v10, %v1472_v49 }
 0x74d   : > { %v849_v53 = vpop.xlane.xlu1 %848 }
 0x74e   : > { %1249 = vrcp.f32 %v849_v53 }
 0x758   : > { %v1250_v54 = vpop.eup %1249 }
 0x794   : > { %v893_v55 = vpop.f32.mrb[12].mxu0 }
 0x795   : > { %v900_v56 = vmul.f32 %v1250_v54, %v893_v55  ;;  %v1152_v57 = vpop.f32.mrb[13].mxu0 }
 0x796   : > { %v896_v58 = vpop.f32.mrb[14].mxu0 }
 0x797   : > { %v901_v59 = vpack.c.bf16 %v900_v56, %v900_v56  ;;  %v1153_v60 = vpop.f32.mrb[15].mxu0 }
 0x799   : > { %1157 = vmatmul.mubr.msk.bf16.vlgmr.msra.gmra.mrb[8].mxu0 %vm300_vm2, %v901_v59 }
 0x86c   : > { %v947_v62 = vpop.f32.mrb[8].mxu0 }
 0x86d   : > { %v1161_v63 = vadd.f32 %v947_v62, %v460_v61  ;;  %v1158_v0 = vpop.f32.mrb[9].mxu0 }
 0x86e   : > { %v950_v1 = vpop.f32.mrb[10].mxu0 }
 0x86f   : > { %v1159_v2 = vpop.f32.mrb[11].mxu0  ;;  %954 = vst.msk [vmem:[%s188_s8] sm:$0xff] %vm243_vm0, %v1161_v63 }
 0x870   : > { %1264 = shalt.err (!%p1261_p3)
}
 0x871   : > { %s1265_s23 = scalar_lea.hbm %s1526_s12, 128  ;;  %s1269_s29 = scalar_lea.hbm %s1573_s4, 256 }
 0x872   : > { %p1266_p4 = scmp.ne.s32.totalorder %s1526_s12, %s1265_s23  ;;  %p1270_p9 = scmp.lt.u32.totalorder %s1526_s12, %s1573_s4 }
 0x873   : > { %p1271_p10 = scmp.lt.u32.totalorder %s1269_s29, %s1265_s23  ;;  %p1273_p12 = scmp.lt.u32.totalorder %s1265_s23, %s1526_s12 }
 0x874   : > { %p1267_p7 = pnand %p1266_p4, %p1389_p5 }
 0x875   : > { %p1272_p11 = por %p1271_p10, %p1270_p9 }
 0x876   : > { %p1268_p8 = pneg %p1267_p7 }
 0x877   : > { %p1274_p13 = por %p1273_p12, %p1272_p11 }
 0x879   : > { %p1275_p0 = pnand %p1274_p13, %p1268_p8 }
 0x87b   : > { %1278 = shalt.err (!%p1275_p0)
}
 0x87c   : > { %1170 = dma.vmem_to_hbm [thread:$0]  (%p1389_p5), %s1528_s9, 128, %s1526_s12, %s956_s19  }
 0x87d PF: > { %p1176_p1 = scmp.ge.s32.totalorder %s1313_s18, 2  ;;  %s981_s6 = sand.u32 1, %s1301_s15  }
 0x87e   : > { %s982_s7 = scalar_lea.sflag [#allocation3], %s981_s6 }
 0x87f   : > { %p1173_p2 = pnand %p1176_p1, %p1393_p6 }
 0x881   : > { %1296 = dma.done.wait (!%p1173_p2), %s982_s7, 128  }
 0x882   : > { %1298 = vsyncadd (!%p1173_p2), %s982_s7, 4294967168  ;;  %p14_p3 = scmp.ge.s32.totalorder %s1376_s21, 4   ;;  %s1576_s15 = smov %s1305_s16 }
 0x883   : > { %s1577_s16 = smov %s1309_s17  ;;  %s1578_s17 = smov %s1387_s24 }
 0x884   : > { %s1579_s18 = smov %s1376_s21  ;;  %16 = sbr.rel (!%p14_p3) target bundleno = 3 (0x3), region = 71 }
 0x88b   :  { %987 = vsyncpa [#allocation3], 1 }
 0x88c   :  { %989 = vsyncpa [#allocation3 + $0x1], 1 }

</bundles_post_ra>
